<compile_context>
chip_gen: v7x
topology: tpu7x:2x2x1
jax: 0.10.0
libtpu: 0.0.40
codegen_flags: <defaults>
</compile_context>

<pallas_src>
import functools

import jax
import jax.numpy as jnp
from jax.experimental import pallas as pl
from jax.experimental.pallas import tpu as pltpu


def _ce_label_smooth_kernel(t_ref, x_ref, o_ref, *, epsilon, num_classes,
                            batch_size, block_b):
    """One batch tile: accumulate the label-smoothed NLL sum into o_ref[0, 0]."""
    i = pl.program_id(0)

    @pl.when(i == 0)
    def _init():
        o_ref[0, 0] = jnp.float32(0.0)

    x = x_ref[...].astype(jnp.float32)            # (TB, C) logits (upcast per-tile)
    t = t_ref[...]                                # (TB, 1) int32 labels
    tb, c = x.shape

    # Row-wise numerically stable log-softmax pieces (no full log_probs tensor).
    m = jnp.max(x, axis=1, keepdims=True)                              # (TB, 1)
    shifted = x - m                                                    # (TB, C)
    lse = jnp.log(jnp.sum(jnp.exp(shifted), axis=1, keepdims=True))    # (TB, 1)

    # log_prob at the target class: shifted[t] - lse  (one-hot never materialized).
    class_iota = jax.lax.broadcasted_iota(jnp.int32, (tb, c), 1)
    target_shifted = jnp.sum(
        jnp.where(class_iota == t, shifted, 0.0), axis=1, keepdims=True)  # (TB, 1)

    # sum_c log_probs = sum_c shifted - C * lse
    row_sum_shifted = jnp.sum(shifted, axis=1, keepdims=True)          # (TB, 1)

    loss_row = (-(1.0 - epsilon) * (target_shifted - lse)
                - (epsilon / num_classes) * (row_sum_shifted - num_classes * lse))

    # Mask padded/garbage rows of the final (remainder) tile.
    row_iota = jax.lax.broadcasted_iota(jnp.int32, (tb, 1), 0)
    valid = (row_iota + i * block_b) < batch_size
    partial = jnp.sum(jnp.where(valid, loss_row, 0.0))

    o_ref[0, 0] += partial

    @pl.when(i == pl.num_programs(0) - 1)
    def _finalize():
        # mean over the batch is applied exactly once, at the very end.
        o_ref[0, 0] = o_ref[0, 0] / jnp.float32(batch_size)


def _pick_block_b(batch, num_classes, itemsize,
                  vmem_budget_bytes=12 * 1024 * 1024):
    """Largest batch tile whose double-buffered logits fit a conservative VMEM budget."""
    # sublane packing granularity: 8 rows for 4-byte, 16 for 2-byte, 32 for 1-byte
    sublane = max(8, 32 // itemsize)
    rows = max(1, vmem_budget_bytes // (2 * num_classes * itemsize))
    if rows >= batch:
        return batch                      # single tile == full array (any B allowed)
    return max(sublane, (rows // sublane) * sublane)


def cross_entropy_label_smooth(inputs, targets, *, epsilon=0.1, block_b=None):
    """inputs: (B, C) float logits ; targets: (B,) int class ids. Returns scalar f32."""
    batch, num_classes = inputs.shape
    targets_2d = targets.astype(jnp.int32).reshape(batch, 1)

    if block_b is None:
        block_b = _pick_block_b(batch, num_classes, inputs.dtype.itemsize)
    block_b = min(block_b, batch)
    num_blocks = pl.cdiv(batch, block_b)

    kernel = functools.partial(
        _ce_label_smooth_kernel,
        epsilon=float(epsilon),
        num_classes=num_classes,
        batch_size=batch,
        block_b=block_b,
    )

    out = pl.pallas_call(
        kernel,
        out_shape=jax.ShapeDtypeStruct((1, 1), jnp.float32),
        grid_spec=pltpu.PrefetchScalarGridSpec(
            num_scalar_prefetch=0,
            grid=(num_blocks,),
            in_specs=[
                pl.BlockSpec((block_b, 1), lambda i: (i, 0)),             # targets
                pl.BlockSpec((block_b, num_classes), lambda i: (i, 0)),   # logits
            ],
            out_specs=pl.BlockSpec((1, 1), lambda i: (0, 0),
                                   memory_space=pltpu.MemorySpace.SMEM),
        ),
        compiler_params=pltpu.CompilerParams(
            dimension_semantics=("arbitrary",)),
    )(targets_2d, inputs)
    return out[0, 0]


def _reference(inputs, targets, epsilon=0.1):
    # Pure-JAX reference mirroring the PyTorch forward.
    _, num_classes = inputs.shape
    log_probs = jax.nn.log_softmax(inputs.astype(jnp.float32), axis=1)
    one_hot = jax.nn.one_hot(targets, num_classes, dtype=jnp.float32)
    smoothed = (1.0 - epsilon) * one_hot + epsilon / num_classes
    return jnp.sum(jnp.mean(-smoothed * log_probs, axis=0))


if __name__ == "__main__":
    key = jax.random.PRNGKey(0)
    k1, k2, k3, k4 = jax.random.split(key, 4)

    # Case 1: f32 logits, single-tile path.
    batch, num_classes = 32, 128
    logits = jax.random.normal(k1, (batch, num_classes), dtype=jnp.float32)
    labels = jax.random.randint(k2, (batch,), 0, num_classes, dtype=jnp.int32)

    loss = jax.block_until_ready(
        cross_entropy_label_smooth(logits, labels, epsilon=0.1))
    ref = _reference(logits, labels, epsilon=0.1)
    assert jnp.allclose(loss, ref, atol=1e-5, rtol=1e-5), (loss, ref)

    # Case 2: bf16 logits, multi-tile grid with a remainder tile (masking path).
    batch2, num_classes2 = 36, 256
    logits2 = jax.random.normal(k3, (batch2, num_classes2), dtype=jnp.bfloat16)
    labels2 = jax.random.randint(k4, (batch2,), 0, num_classes2, dtype=jnp.int32)

    loss2 = jax.block_until_ready(
        cross_entropy_label_smooth(logits2, labels2, epsilon=0.1, block_b=16))
    ref2 = _reference(logits2.astype(jnp.float32), labels2, epsilon=0.1)
    assert jnp.allclose(loss2, ref2, atol=1e-4, rtol=1e-4), (loss2, ref2)

    print("KERNEL_OK")
</pallas_src>

<mosaic_0001>
module attributes {stable_mosaic.version = 11 : i64} {
  func.func @_ce_label_smooth_kernel(%arg0: i32, %arg1: memref<32x1xi32, #tpu.memory_space<vmem>>, %arg2: memref<32x128xf32, #tpu.memory_space<vmem>>, %arg3: memref<1x1xf32, #tpu.memory_space<smem>>) attributes {dimension_semantics = [#tpu.dimension_semantics<arbitrary>], iteration_bounds = array<i64: 1>, scalar_prefetch = 0 : i64, scratch_operands = 0 : i64, tpu.core_type = #tpu.core_type<tc>, window_params = [{transform_indices = @transform_0, window_bounds = array<i64: 32, 1>}, {transform_indices = @transform_1, window_bounds = array<i64: 32, 128>}, {transform_indices = @transform_2, window_bounds = array<i64: 1, 1>}]} {
    %c0_i32 = arith.constant 0 : i32
    %0 = arith.cmpi eq, %arg0, %c0_i32 : i32
    %1 = arith.extui %0 : i1 to i32
    %c0_i32_0 = arith.constant 0 : i32
    %2 = arith.cmpi ne, %1, %c0_i32_0 : i32
    scf.if %2 {
      %cst_20 = arith.constant 0.000000e+00 : f32
      %c0_21 = arith.constant 0 : index
      %c0_22 = arith.constant 0 : index
      %49 = memref.load %arg3[%c0_21, %c0_22] : memref<1x1xf32, #tpu.memory_space<smem>>
      memref.store %cst_20, %arg3[%c0_21, %c0_22] : memref<1x1xf32, #tpu.memory_space<smem>>
    } else {
    }
    %c0 = arith.constant 0 : index
    %c0_1 = arith.constant 0 : index
    %3 = vector.load %arg2[%c0, %c0_1] : memref<32x128xf32, #tpu.memory_space<vmem>>, vector<32x128xf32>
    %c0_2 = arith.constant 0 : index
    %c0_3 = arith.constant 0 : index
    %4 = vector.load %arg1[%c0_2, %c0_3] : memref<32x1xi32, #tpu.memory_space<vmem>>, vector<32x1xi32>
    %cst = arith.constant dense<0xFF800000> : vector<32xf32>
    %5 = vector.multi_reduction <maximumf>, %3, %cst [1] : vector<32x128xf32> to vector<32xf32>
    %6 = vector.shape_cast %5 : vector<32xf32> to vector<32x1xf32>
    %7 = vector.broadcast %6 : vector<32x1xf32> to vector<32x128xf32>
    %8 = arith.subf %3, %7 : vector<32x128xf32>
    %9 = math.exp %8 : vector<32x128xf32>
    %cst_4 = arith.constant dense<0.000000e+00> : vector<32xf32>
    %10 = vector.multi_reduction <add>, %9, %cst_4 [1] : vector<32x128xf32> to vector<32xf32>
    %11 = vector.shape_cast %10 : vector<32xf32> to vector<32x1xf32>
    %12 = math.log %11 : vector<32x1xf32>
    %13 = tpu.iota {dimensions = array<i32: 1>} : vector<32x128xi32>
    %14 = vector.broadcast %4 : vector<32x1xi32> to vector<32x128xi32>
    %15 = arith.cmpi eq, %13, %14 : vector<32x128xi32>
    %cst_5 = arith.constant 0.000000e+00 : f32
    %16 = vector.broadcast %cst_5 : f32 to vector<32x128xf32>
    %17 = arith.select %15, %8, %16 : vector<32x128xi1>, vector<32x128xf32>
    %cst_6 = arith.constant dense<0.000000e+00> : vector<32xf32>
    %18 = vector.multi_reduction <add>, %17, %cst_6 [1] : vector<32x128xf32> to vector<32xf32>
    %19 = vector.shape_cast %18 : vector<32xf32> to vector<32x1xf32>
    %cst_7 = arith.constant dense<0.000000e+00> : vector<32xf32>
    %20 = vector.multi_reduction <add>, %8, %cst_7 [1] : vector<32x128xf32> to vector<32xf32>
    %21 = vector.shape_cast %20 : vector<32xf32> to vector<32x1xf32>
    %22 = arith.subf %19, %12 : vector<32x1xf32>
    %cst_8 = arith.constant -0.899999976 : f32
    %23 = vector.broadcast %cst_8 : f32 to vector<32x1xf32>
    %24 = arith.mulf %23, %22 : vector<32x1xf32>
    %cst_9 = arith.constant 1.280000e+02 : f32
    %25 = vector.broadcast %cst_9 : f32 to vector<32x1xf32>
    %26 = arith.mulf %25, %12 : vector<32x1xf32>
    %27 = arith.subf %21, %26 : vector<32x1xf32>
    %cst_10 = arith.constant 7.812500e-04 : f32
    %28 = vector.broadcast %cst_10 : f32 to vector<32x1xf32>
    %29 = arith.mulf %28, %27 : vector<32x1xf32>
    %30 = arith.subf %24, %29 : vector<32x1xf32>
    %31 = tpu.iota {dimensions = array<i32: 0>} : vector<32x1xi32>
    %c32_i32 = arith.constant 32 : i32
    %32 = arith.muli %arg0, %c32_i32 : i32
    %33 = vector.broadcast %32 : i32 to vector<32x1xi32>
    %34 = arith.addi %31, %33 : vector<32x1xi32>
    %c32_i32_11 = arith.constant 32 : i32
    %35 = vector.broadcast %c32_i32_11 : i32 to vector<32x1xi32>
    %36 = arith.cmpi slt, %34, %35 : vector<32x1xi32>
    %cst_12 = arith.constant 0.000000e+00 : f32
    %37 = vector.broadcast %cst_12 : f32 to vector<32x1xf32>
    %38 = arith.select %36, %30, %37 : vector<32x1xi1>, vector<32x1xf32>
    %39 = vector.shape_cast %38 : vector<32x1xf32> to vector<1x32x1xf32>
    %cst_13 = arith.constant dense<0.000000e+00> : vector<1xf32>
    %40 = vector.multi_reduction <add>, %39, %cst_13 [1, 2] : vector<1x32x1xf32> to vector<1xf32>
    %41 = vector.shape_cast %40 : vector<1xf32> to vector<1x1x1xf32>
    %42 = vector.extract %41[0, 0, 0] : f32 from vector<1x1x1xf32>
    %c0_14 = arith.constant 0 : index
    %c0_15 = arith.constant 0 : index
    %43 = memref.load %arg3[%c0_14, %c0_15] : memref<1x1xf32, #tpu.memory_space<smem>>
    %44 = arith.addf %43, %42 : f32
    %c0_16 = arith.constant 0 : index
    %c0_17 = arith.constant 0 : index
    %45 = memref.load %arg3[%c0_16, %c0_17] : memref<1x1xf32, #tpu.memory_space<smem>>
    memref.store %44, %arg3[%c0_16, %c0_17] : memref<1x1xf32, #tpu.memory_space<smem>>
    %c0_i32_18 = arith.constant 0 : i32
    %46 = arith.cmpi eq, %arg0, %c0_i32_18 : i32
    %47 = arith.extui %46 : i1 to i32
    %c0_i32_19 = arith.constant 0 : i32
    %48 = arith.cmpi ne, %47, %c0_i32_19 : i32
    scf.if %48 {
      %c0_20 = arith.constant 0 : index
      %c0_21 = arith.constant 0 : index
      %49 = memref.load %arg3[%c0_20, %c0_21] : memref<1x1xf32, #tpu.memory_space<smem>>
      %cst_22 = arith.constant 3.200000e+01 : f32
      %50 = arith.divf %49, %cst_22 : f32
      %c0_23 = arith.constant 0 : index
      %c0_24 = arith.constant 0 : index
      %51 = memref.load %arg3[%c0_23, %c0_24] : memref<1x1xf32, #tpu.memory_space<smem>>
      memref.store %50, %arg3[%c0_23, %c0_24] : memref<1x1xf32, #tpu.memory_space<smem>>
    } else {
    }
    return
  }
  func.func @transform_0(%arg0: i32) -> (i32, i32) {
    %c0_i32 = arith.constant 0 : i32
    %c0_i32_0 = arith.constant 0 : i32
    return %arg0, %c0_i32 : i32, i32
  }
  func.func @transform_1(%arg0: i32) -> (i32, i32) {
    %c0_i32 = arith.constant 0 : i32
    %c0_i32_0 = arith.constant 0 : i32
    return %arg0, %c0_i32 : i32, i32
  }
  func.func @transform_2(%arg0: i32) -> (i32, i32) {
    %c0_i32 = arith.constant 0 : i32
    %c0_i32_0 = arith.constant 0 : i32
    %c0_i32_1 = arith.constant 0 : i32
    return %c0_i32, %c0_i32_0 : i32, i32
  }
}

</mosaic_0001>

<bundles_post_ra>
// kernel: tpu_custom_call.1
= control target key start
LH: loop header
LB: loop body
LE: loop exit
PB: predicated region body
PF: predicated region fallthrough
CT: control target
= control target key end

     0   :  { %v220_v4 = vmov 0   ;;  %s273_s0 = inlined_call_operand.vmem [shape: s32[32,1], index: 0, kind: input, shape index: {}]   ;;  %s274_s1 = inlined_call_operand.vmem [shape: f32[32,128], index: 1, kind: input, shape index: {}]   ;;  %s275_s2 = inlined_call_operand.hbm [shape: f32[1,1], index: 2, kind: output, shape index: {}]  }
   0x1   :  { %v20_v0 = vld [vmem:[%s274_s1 + $0x10] sm:$0xff]  ;;  %v18_v1 = vld [vmem:[%s274_s1] sm:$0xff]  ;;  %v21_v2 = vld [vmem:[%s274_s1 + $0x18] sm:$0xff]  ;;  %191 = vset.pattern.permute.xlu1 %v220_v4  ;;  %190 = vset.pattern.permute.xlu0 %v220_v4 }
   0x2   :  { %30 = vmax.xlane.f32.xlu1 %v20_v0  ;;  %26 = vmax.xlane.f32.xlu0 %v18_v1  ;;  %v19_v3 = vld [vmem:[%s274_s1 + $0x8] sm:$0xff] }
   0x3   :  { %7 = vsyncpa [#allocation3], 0  ;;  %v23_v5 = vld [vmem:[%s273_s0 + $0x8] sm:$0xff]  ;;  %v24_v6 = vld [vmem:[%s273_s0 + $0x10] sm:$0xff]  ;;  %v62_v20 = vlaneseq  ;;  %vm143_vm4 = vcmask 7168   ;;  %s208_s27 = scalar_lea.hbm %s275_s2, 16 }
   0x4   :  { %v22_v7 = vld [vmem:[%s273_s0] sm:$0xff]  ;;  %v25_v8 = vld [vmem:[%s273_s0 + $0x18] sm:$0xff]  ;;  %p209_p0 = scmp.ne.s32.totalorder %s275_s2, %s208_s27  ;;  %p212_p1 = scmp.lt.u32.totalorder %s208_s27, %s275_s2 }
   0x5   :  { %v63_v24 = vand.u32 127, %v62_v20 }
   0x6   :  { %32 = vmax.xlane.f32.xlu1 %v21_v2  ;;  %28 = vmax.xlane.f32.xlu0 %v19_v3  ;;  %p214_p2 = pnand %p212_p1, %p209_p0 }
  0x17   :  { %68 = vperm.xlu1 %191, %v23_v5  }
  0x1b   :  { %71 = vperm.xlu1 %191, %v24_v6  }
  0x1c   :  { %65 = vperm.xlu0 %190, %v22_v7  }
  0x1f   :  { %74 = vperm.xlu1 %191, %v25_v8  }
  0x8f   :  { %v27_v9 = vpop.xlane.xlu0 %26  ;;  %v31_v10 = vpop.xlane.xlu1 %30 }
  0x90   :  { %v34_v11 = vsub.f32 %v18_v1, %v27_v9  ;;  %v36_v13 = vsub.f32 %v20_v0, %v31_v10 }
  0x92   :  { %v38_v12 = vmul.f32 1.442695, %v34_v11  ;;  %v42_v18 = vmul.f32 1.442695, %v36_v13 }
  0x93   :  { %v29_v14 = vpop.xlane.xlu0 %28  ;;  %v33_v16 = vpop.xlane.xlu1 %32 }
  0x94   :  { %v35_v15 = vsub.f32 %v19_v3, %v29_v14  ;;  %192 = vpow2.f32 %v38_v12  ;;  %v37_v19 = vsub.f32 %v21_v2, %v33_v16 }
  0x96   :  { %v40_v17 = vmul.f32 1.442695, %v35_v15  ;;  %v44_v21 = vmul.f32 1.442695, %v37_v19 }
  0x97   :  { %v69_v22 = vpop.permute.xlu1 %68 }
  0x98   :  { %194 = vpow2.f32 %v40_v17  ;;  %vm77_vm2 = vcmp.eq.s32.totalorder %v63_v24, %v69_v22 }
  0x99   :  { %196 = vpow2.f32 %v42_v18  ;;  %v81_v34 = vsel %vm77_vm2, %v35_v15, 0.0 }
  0x9a   :  { %198 = vpow2.f32 %v44_v21 }
  0x9b   :  { %v66_v23 = vpop.permute.xlu0 %65  ;;  %v72_v27 = vpop.permute.xlu1 %71 }
  0x9c   :  { %vm76_vm0 = vcmp.eq.s32.totalorder %v63_v24, %v66_v23  ;;  %vm78_vm1 = vcmp.eq.s32.totalorder %v63_v24, %v72_v27 }
  0x9d   :  { %v80_v28 = vsel %vm76_vm0, %v34_v11, 0.0  ;;  %v82_v32 = vsel %vm78_vm1, %v36_v13, 0.0 }
  0x9e   :  { %v193_v25 = vpop.eup %192 }
  0x9f   :  { %46 = vadd.xlane.f32.xlu1 %v193_v25  ;;  %v75_v31 = vpop.permute.xlu1 %74 }
  0xa0   :  { %vm79_vm3 = vcmp.eq.s32.totalorder %v63_v24, %v75_v31 }
  0xa1   :  { %v83_v33 = vsel %vm79_vm3, %v37_v19, 0.0 }
  0xa2   :  { %v195_v26 = vpop.eup %194 }
  0xa3   :  { %48 = vadd.xlane.f32.xlu0 %v195_v26  ;;  %84 = vadd.xlane.f32.xlu1 %v80_v28  ;;  %v197_v29 = vpop.eup %196 }
  0xa4   :  { %v199_v30 = vpop.eup %198 }
  0xa7   :  { %92 = vadd.xlane.f32.xlu0 %v34_v11  ;;  %50 = vadd.xlane.f32.xlu1 %v197_v29 }
  0xab   :  { %88 = vadd.xlane.f32.xlu0 %v82_v32  ;;  %52 = vadd.xlane.f32.xlu1 %v199_v30 }
  0xaf   :  { %90 = vadd.xlane.f32.xlu0 %v83_v33  ;;  %86 = vadd.xlane.f32.xlu1 %v81_v34 }
  0xb3   :  { %94 = vadd.xlane.f32.xlu1 %v35_v15 }
  0xb7   :  { %96 = vadd.xlane.f32.xlu1 %v36_v13 }
  0xbb   :  { %98 = vadd.xlane.f32.xlu1 %v37_v19 }
 0x12c   :  { %v47_v35 = vpop.xlane.xlu1 %46 }
 0x12d   :  { %200 = vlog2.f32 %v47_v35 }
 0x130   :  { %v85_v36 = vpop.xlane.xlu1 %84  ;;  %v49_v37 = vpop.xlane.xlu0 %48 }
 0x131   :  { %202 = vlog2.f32 %v49_v37 }
 0x134   :  { %v51_v38 = vpop.xlane.xlu1 %50  ;;  %v93_v42 = vpop.xlane.xlu0 %92 }
 0x135   :  { %204 = vlog2.f32 %v51_v38 }
 0x137   :  { %v201_v39 = vpop.eup %200 }
 0x138   :  { %v55_v40 = vmul.f32 0.6931472, %v201_v39  ;;  %v53_v41 = vpop.xlane.xlu1 %52  ;;  %v89_v52 = vpop.xlane.xlu0 %88 }
 0x139   :  { %206 = vlog2.f32 %v53_v41 }
 0x13a   :  { %v108_v44 = vmul.f32 128.0, %v55_v40  ;;  %v100_v54 = vsub.f32 %v85_v36, %v55_v40 }
 0x13b   :  { %v203_v43 = vpop.eup %202 }
 0x13c   :  { %v87_v45 = vpop.xlane.xlu1 %86  ;;  %v57_v46 = vmul.f32 0.6931472, %v203_v43  ;;  %v112_v49 = vsub.f32 %v93_v42, %v108_v44  ;;  %v104_v0 = vmul.f32 -0.9, %v100_v54  ;;  %v91_v3 = vpop.xlane.xlu0 %90 }
 0x13e   :  { %v109_v47 = vmul.f32 128.0, %v57_v46  ;;  %v101_v50 = vsub.f32 %v87_v45, %v57_v46  ;;  %v116_v58 = vmul.f32 0.00078125, %v112_v49 }
 0x13f   :  { %v205_v48 = vpop.eup %204 }
 0x140   :  { %v59_v51 = vmul.f32 0.6931472, %v205_v48  ;;  %v95_v53 = vpop.xlane.xlu1 %94  ;;  %v105_v60 = vmul.f32 -0.9, %v101_v50  ;;  %v120_v5 = vsub.f32 %v104_v0, %v116_v58 }
 0x141   :  { %v113_v55 = vsub.f32 %v95_v53, %v109_v47 }
 0x142   :  { %v110_v56 = vmul.f32 128.0, %v59_v51  ;;  %v102_v59 = vsub.f32 %v89_v52, %v59_v51  ;;  %v144_v13 = vsel %vm143_vm4, %v120_v5, 0.0 }
 0x143   :  { %v207_v57 = vpop.eup %206  ;;  %v117_v61 = vmul.f32 0.00078125, %v113_v55 }
 0x144   :  { %v61_v62 = vmul.f32 0.6931472, %v207_v57  ;;  %v97_v63 = vpop.xlane.xlu1 %96  ;;  %v106_v6 = vmul.f32 -0.9, %v102_v59 }
 0x145   :  { %v121_v1 = vsub.f32 %v105_v60, %v117_v61  ;;  %v114_v2 = vsub.f32 %v97_v63, %v110_v56 }
 0x146   :  { %v111_v4 = vmul.f32 128.0, %v61_v62  ;;  %v103_v7 = vsub.f32 %v91_v3, %v61_v62 }
 0x147   :  { %v118_v8 = vmul.f32 0.00078125, %v114_v2  ;;  %v145_v10 = vsel %vm143_vm4, %v121_v1, 0.0 }
 0x148   :  { %v99_v9 = vpop.xlane.xlu1 %98  ;;  %v107_v14 = vmul.f32 -0.9, %v103_v7  ;;  %v146_v17 = vadd.f32 %v145_v10, %v144_v13 }
 0x149   :  { %v122_v11 = vsub.f32 %v106_v6, %v118_v8  ;;  %v115_v12 = vsub.f32 %v99_v9, %v111_v4 }
 0x14b   :  { %v119_v15 = vmul.f32 0.00078125, %v115_v12  ;;  %v147_v16 = vsel %vm143_vm4, %v122_v11, 0.0 }
 0x14c   :  { %v148_v19 = vadd.f32 %v147_v16, %v146_v17 }
 0x14d   :  { %v123_v18 = vsub.f32 %v107_v14, %v119_v15 }
 0x14f   :  { %v149_v20 = vsel %vm143_vm4, %v123_v18, 0.0 }
 0x150   :  { %v150_v21 = vadd.f32 %v149_v20, %v148_v19 }
 0x152   :  { %151 = vadd.xlane.f32.xlu0 %v150_v21 }
 0x1df   :  { %v152_v22 = vpop.xlane.xlu0 %151 }
 0x1e0   :  { %v153_v23 = vrot.slane %v152_v22, 4 }
 0x1e2   :  { %v154_v24 = vadd.f32 %v153_v23, %v152_v22 }
 0x1e4   :  { %v155_v25 = vrot.slane %v154_v24, 2 }
 0x1e6   :  { %v156_v26 = vadd.f32 %v155_v25, %v154_v24 }
 0x1e8   :  { %v157_v27 = vrot.slane %v156_v26, 1 }
 0x1ea   :  { %v158_v28 = vadd.f32 %v157_v27, %v156_v26 }
 0x1ec   :  { %185 = vpush %v158_v28 }
 0x21d   :  { %s186_s0 = spop %185 }
 0x21e   :  { %s170_s24 = smul.f32 0.03125, %s186_s0 }
 0x220   :  { %171 = sst [smem:[#allocation2]] %s170_s24 }
 0x221   :  { %217 = shalt.err (!%p214_p2)
}
 0x222   :  { %s221_s4 = smov [#allocation2]  }
 0x223   :  { %179 = dma.smem_to_hbm %s221_s4, 16, %s275_s2, [#allocation3]  }
 0x224   :  { %218 = dma.done.wait [#allocation3], 16  }
 0x225   :  { %219 = vsyncadd [#allocation3], 4294967280 }
 0x226   :  { %183 = sfence }
 0x227   :  { %184 = vsyncpa [#allocation3], 1 }

</bundles_post_ra>
